<compile_context>
chip_gen: v5e
topology: v5e:2x2
jax: 0.10.0
libtpu: 0.0.40
codegen_flags: <defaults>
</compile_context>

<pallas_src>
import jax
import jax.numpy as jnp
from jax.experimental import pallas as pl
from jax.experimental.pallas import tpu as pltpu

LANE = 128                 # vreg lane width; keep last dim a multiple of this
SUBLANE = 8                # (8, 128) tiling granularity for int32/f32
MAX_BLOCK_ROWS = 4096      # (4096, 128) int32 = 2 MiB per tile buffer
_SMALL_N = 4096            # below this, plain XLA add beats any Pallas launch


def _add_kernel(x_ref, y_ref, o_ref):
    # Pure VPU elementwise add on the current (block_rows, 128) tile.
    o_ref[...] = x_ref[...] + y_ref[...]


def add_pallas(x: jax.Array, y: jax.Array) -> jax.Array:
    """Elementwise add via a tiled, lane-dense Pallas kernel (any shape)."""
    assert x.shape == y.shape and x.dtype == y.dtype
    n = x.size
    orig_shape = x.shape

    # Rows needed at lane width 128, rounded up to the sublane multiple (8).
    rows = -(-n // LANE)
    rows = -(-rows // SUBLANE) * SUBLANE
    block_rows = min(rows, MAX_BLOCK_ROWS)
    # Make rows an exact multiple of the block so the grid tiles evenly.
    rows = -(-rows // block_rows) * block_rows
    padded = rows * LANE

    if padded == n:
        # Already lane/sublane aligned: pure reshape (no copy, no pad).
        xf = x.reshape(rows, LANE)
        yf = y.reshape(rows, LANE)
    else:
        xf = jnp.pad(x.reshape(-1), (0, padded - n)).reshape(rows, LANE)
        yf = jnp.pad(y.reshape(-1), (0, padded - n)).reshape(rows, LANE)

    grid = (rows // block_rows,)
    out2d = pl.pallas_call(
        _add_kernel,
        out_shape=jax.ShapeDtypeStruct((rows, LANE), x.dtype),
        grid=grid,
        in_specs=[
            pl.BlockSpec((block_rows, LANE), lambda i: (i, 0)),
            pl.BlockSpec((block_rows, LANE), lambda i: (i, 0)),
        ],
        out_specs=pl.BlockSpec((block_rows, LANE), lambda i: (i, 0)),
        compiler_params=pltpu.CompilerParams(
            dimension_semantics=("parallel",),   # megacore sharding on v7x
            vmem_limit_bytes=32 << 20,           # headroom on v5e, safe on v7x
        ),
    )(xf, yf)

    if padded == n:
        return out2d.reshape(orig_shape)
    return out2d.reshape(-1)[:n].reshape(orig_shape)


def add(x: jax.Array, y: jax.Array) -> jax.Array:
    """Forward pass of AddModule2.

    For nanoseconds-scale inputs (like the (5,) example) Pallas is 100% launch
    overhead, so let XLA emit the fused elementwise add directly.
    """
    if x.size < _SMALL_N:
        return x + y
    return add_pallas(x, y)


if __name__ == "__main__":
    key = jax.random.PRNGKey(0)
    kx, ky, kx2, ky2 = jax.random.split(key, 4)

    # 1) The module's example_input shape: two int32 vectors of length 5.
    x = jax.random.randint(kx, (5,), minval=-100, maxval=100, dtype=jnp.int32)
    y = jax.random.randint(ky, (5,), minval=-100, maxval=100, dtype=jnp.int32)
    out_small = add_pallas(x, y)           # exercise the Pallas kernel itself
    jax.block_until_ready(out_small)
    assert out_small.dtype == jnp.int32 and out_small.shape == (5,)
    assert jnp.array_equal(out_small, x + y), (out_small, x + y)
    # Also check the dispatching wrapper (XLA path at this size).
    assert jnp.array_equal(add(x, y), x + y)

    # 2) A larger, non-multiple-of-1024 size to exercise padding + tiling.
    n_big = 3 * 4096 * 128 + 77
    xb = jax.random.randint(kx2, (n_big,), minval=-1000, maxval=1000, dtype=jnp.int32)
    yb = jax.random.randint(ky2, (n_big,), minval=-1000, maxval=1000, dtype=jnp.int32)
    out_big = add_pallas(xb, yb)
    jax.block_until_ready(out_big)
    assert out_big.dtype == jnp.int32 and out_big.shape == (n_big,)
    assert jnp.array_equal(out_big, xb + yb)

    # 3) Exactly-aligned size: exercises the zero-pad fast path.
    n_al = 2 * 4096 * 128
    xa = jax.random.randint(kx, (n_al,), minval=-1000, maxval=1000, dtype=jnp.int32)
    ya = jax.random.randint(ky, (n_al,), minval=-1000, maxval=1000, dtype=jnp.int32)
    out_al = add_pallas(xa, ya)
    jax.block_until_ready(out_al)
    assert jnp.array_equal(out_al, xa + ya)

    print("KERNEL_OK")
</pallas_src>

<mosaic_0001>
module attributes {stable_mosaic.version = 11 : i64} {
  func.func @_add_kernel(%arg0: i32, %arg1: memref<8x128xi32, #tpu.memory_space<vmem>>, %arg2: memref<8x128xi32, #tpu.memory_space<vmem>>, %arg3: memref<8x128xi32, #tpu.memory_space<vmem>>) attributes {dimension_semantics = [#tpu.dimension_semantics<parallel>], iteration_bounds = array<i64: 1>, scalar_prefetch = 0 : i64, scratch_operands = 0 : i64, tpu.core_type = #tpu.core_type<tc>, window_params = [{transform_indices = @transform_0, window_bounds = array<i64: 8, 128>}, {transform_indices = @transform_1, window_bounds = array<i64: 8, 128>}, {transform_indices = @transform_2, window_bounds = array<i64: 8, 128>}]} {
    %c0 = arith.constant 0 : index
    %c0_0 = arith.constant 0 : index
    %0 = vector.load %arg1[%c0, %c0_0] : memref<8x128xi32, #tpu.memory_space<vmem>>, vector<8x128xi32>
    %c0_1 = arith.constant 0 : index
    %c0_2 = arith.constant 0 : index
    %1 = vector.load %arg2[%c0_1, %c0_2] : memref<8x128xi32, #tpu.memory_space<vmem>>, vector<8x128xi32>
    %2 = arith.addi %0, %1 : vector<8x128xi32>
    %c0_3 = arith.constant 0 : index
    %c0_4 = arith.constant 0 : index
    %3 = vector.load %arg3[%c0_3, %c0_4] : memref<8x128xi32, #tpu.memory_space<vmem>>, vector<8x128xi32>
    tpu.vector_store %arg3[%c0_3, %c0_4], %2 {strides = array<i32>} : memref<8x128xi32, #tpu.memory_space<vmem>>, vector<8x128xi32>,
    return
  }
  func.func @transform_0(%arg0: i32) -> (i32, i32) {
    %c0_i32 = arith.constant 0 : i32
    %c0_i32_0 = arith.constant 0 : i32
    return %arg0, %c0_i32 : i32, i32
  }
  func.func @transform_1(%arg0: i32) -> (i32, i32) {
    %c0_i32 = arith.constant 0 : i32
    %c0_i32_0 = arith.constant 0 : i32
    return %arg0, %c0_i32 : i32, i32
  }
  func.func @transform_2(%arg0: i32) -> (i32, i32) {
    %c0_i32 = arith.constant 0 : i32
    %c0_i32_0 = arith.constant 0 : i32
    return %arg0, %c0_i32 : i32, i32
  }
}

</mosaic_0001>

<bundles_post_ra>
// kernel: tpu_custom_call.1
= control target key start
LH: loop header
LB: loop body
LE: loop exit
PB: predicated region body
PF: predicated region fallthrough
CT: control target
= control target key end

     0   :  { %7 = vsyncpa [#allocation3], 0  ;;  %s170_s0 = inlined_call_operand.hbm [shape: s32[8,128], index: 0, kind: input, shape index: {}]   ;;  %s171_s1 = inlined_call_operand.hbm [shape: s32[8,128], index: 1, kind: input, shape index: {}]   ;;  %s172_s2 = inlined_call_operand.hbm [shape: s32[8,128], index: 2, kind: output, shape index: {}]  }
   0x1   :  { %8 = vsyncpa [#allocation6], 0 }
   0x2   :  { %9 = vsyncpa [#allocation4], 0  ;;  %s15_s11 = sshll.u32 %s170_s0, 4  ;;  %s143_s12 = smov [#allocation2]   ;;  %s16_s11 = int_to_ptr.hbm [resolvable:$true] %s15_s11 }
   0x3   :  { %s17_s13 = sshll.u32 %s143_s12, 4  ;;  %s26_s16 = sshll.u32 %s171_s1, 4  ;;  %s18_s13 = int_to_ptr.vmem [resolvable:$true] %s17_s13  ;;  %s27_s16 = int_to_ptr.hbm [resolvable:$true] %s26_s16 }
   0x4   :  { %20 = dma.hbm_to_vmem [thread:$0]  %s16_s11, 128, %s18_s13, [#allocation3]  }
   0x5   :  { %s144_s17 = smov [#allocation5]  }
   0x6   :  { %s28_s18 = sshll.u32 %s144_s17, 4  ;;  %s29_s18 = int_to_ptr.vmem [resolvable:$true] %s28_s18 }
   0x7   :  { %31 = dma.hbm_to_vmem [thread:$0]  %s27_s16, 128, %s29_s18, [#allocation6]  }
   0x8   :  { %137 = dma.done.wait [#allocation3], 128  }
   0x9   :  { %138 = vsyncadd [#allocation3], 4294967168 }
   0xa   :  { %139 = dma.done.wait [#allocation6], 128  }
   0xb   :  { %140 = vsyncadd [#allocation6], 4294967168  ;;  %s145_s19 = smov [#allocation7]   ;;  %s51_s22 = sshll.u32 %s172_s2, 4  ;;  %v40_v0 = vld [vmem:[#allocation2] sm:$0xff]  ;;  %v41_v1 = vld [vmem:[#allocation5] sm:$0xff]  ;;  %s52_s22 = int_to_ptr.hbm [resolvable:$true] %s51_s22 }
   0xc   :  { %s49_s0 = sshll.u32 %s145_s19, 4  ;;  %v42_v2 = vadd.s32 %v41_v1, %v40_v0  ;;  %s50_s0 = int_to_ptr.vmem [resolvable:$true] %s49_s0 }
   0xe   :  { %43 = vst [vmem:[#allocation7] sm:$0xff] %v42_v2 }
   0xf   :  { %54 = dma.vmem_to_hbm [thread:$0]  %s50_s0, 128, %s52_s22, [#allocation4]  }
  0x10   :  { %141 = dma.done.wait [#allocation4], 128  }
  0x11   :  { %142 = vsyncadd [#allocation4], 4294967168 }
  0x12   :  { %59 = vsyncpa [#allocation3], 1 }
  0x13   :  { %60 = vsyncpa [#allocation6], 1 }
  0x14   :  { %61 = vsyncpa [#allocation4], 1 }

</bundles_post_ra>
